<compile_context>
chip_gen: v6e
topology: v6e:2x2x1
jax: 0.10.0
libtpu: 0.0.40
codegen_flags: <defaults>
</compile_context>

<pallas_src>
import functools
import math

import jax
import jax.numpy as jnp
from jax.experimental import pallas as pl
from jax.experimental.pallas import tpu as pltpu


# ---------------------------------------------------------------------------
# Kernel 1: label-smoothing KL loss, closed form, per-tile partial sums.
# ---------------------------------------------------------------------------
def _label_smoothing_kernel(x_ref, tgt_ref, out_ref, *,
                            padding_idx, confidence, smooth_val, c_const,
                            n_rows):
    x = x_ref[...].astype(jnp.float32)            # (tn, V)
    tn, v = x.shape
    tgt = tgt_ref[...]                            # (tn, 1) int32

    # Row-validity mask: the grid may overrun N (no host-side padding of x or
    # target), so rows past N carry garbage and must be dropped with a where.
    row0 = pl.program_id(0) * tn
    row_idx = row0 + jax.lax.broadcasted_iota(jnp.int32, (tn, 1), 0)
    row_ok = row_idx < n_rows                     # (tn, 1) bool

    ignore = tgt == padding_idx
    valid = jnp.logical_and(row_ok, jnp.logical_not(ignore))   # (tn, 1)
    tgt_safe = jnp.where(ignore, 0, tgt)          # masked_fill(ignore, 0)

    # log-sum-exp over the vocab (lane) axis
    m = jnp.max(x, axis=-1, keepdims=True)
    lse = m + jnp.log(jnp.sum(jnp.exp(x - m), axis=-1, keepdims=True))  # (tn,1)

    # per-row reductions of x (avoids materializing a full (tn, V) logp)
    sum_x = jnp.sum(x, axis=-1, keepdims=True)                          # (tn,1)
    col = jax.lax.broadcasted_iota(jnp.int32, x.shape, 1)
    x_tgt = jnp.sum(jnp.where(col == tgt_safe, x, 0.0), axis=-1,
                    keepdims=True)                                      # (tn,1)

    logp_tgt = x_tgt - lse
    sum_logp = sum_x - jnp.float32(v) * lse

    kl_row = (jnp.float32(c_const)
              - jnp.float32(confidence - smooth_val) * logp_tgt
              - jnp.float32(smooth_val) * sum_logp)
    # where (not multiply): garbage rows past N may produce inf/nan.
    kl_row = jnp.where(valid, kl_row, 0.0)
    valid_f = valid.astype(jnp.float32)

    kl_sum = jnp.sum(kl_row)
    cnt_sum = jnp.sum(valid_f)

    # Single lane-dense (8,128) slab per grid step:
    #   sublane 0 -> kl partial sum, sublane 1 -> non-padding count, rest 0.
    sub = jax.lax.broadcasted_iota(jnp.int32, out_ref.shape, 0)
    out_ref[...] = jnp.where(sub == 0, kl_sum,
                             jnp.where(sub == 1, cnt_sum, jnp.float32(0.0)))


# ---------------------------------------------------------------------------
# Kernel 2: router load-balancing loss + router z-loss (lane-dense layout).
# ---------------------------------------------------------------------------
def _router_kernel(vals_ref, idx_ref, gate_ref, load_ref, z_ref, *,
                   num_experts, num_elements):
    vals = vals_ref[...].astype(jnp.float32)      # (K, N)
    idx = idx_ref[...]                            # (K, N) int32
    gate = gate_ref[...].astype(jnp.float32)      # (E, N)

    acc = jnp.float32(0.0)
    for e in range(num_experts):                  # small static loop over E
        maskf = (idx == e).astype(jnp.float32)
        expert_load = jnp.sum(maskf)
        logits_sum = jnp.sum(vals * maskf)
        acc = acc + expert_load * logits_sum
    load_ref[0, 0] = (jnp.float32(num_experts) / jnp.float32(num_elements)) * acc

    # router z-loss: mean(logsumexp(gate_logits over experts) ** 2)
    m = jnp.max(gate, axis=0, keepdims=True)      # (1, N)
    lse = m + jnp.log(jnp.sum(jnp.exp(gate - m), axis=0, keepdims=True))
    z_ref[0, 0] = jnp.mean(jnp.square(lse))


# ---------------------------------------------------------------------------
# Wrapper
# ---------------------------------------------------------------------------
def label_smoothing_loss_moe(x, target, topk_values, topk_indices, gate_logits,
                             *, size, padding_idx, smoothing,
                             normalize_length=False, num_experts=8,
                             load_balance_loss_coef=0.0, z_loss_coeff=0.0,
                             row_tile=None):
    B, T, V = x.shape
    assert V == size
    N = B * T

    confidence = 1.0 - smoothing
    smooth_val = smoothing / (size - 1) if size > 1 else 0.0
    # trace-time constant C = sum_j td_j * log(td_j), with 0*log(0) := 0
    c_const = 0.0
    if confidence > 0.0:
        c_const += confidence * math.log(confidence)
    if smooth_val > 0.0:
        c_const += (size - 1) * smooth_val * math.log(smooth_val)

    # Row tile: largest tile whose f32 footprint is ~4 MiB (keeps the kernel
    # near the HBM roofline while staying safe for v7x's 64 MiB VMEM with
    # double buffering + in-kernel f32 temporaries).
    if row_tile is None:
        rt = (4 * 1024 * 1024) // (V * 4)
        row_tile = max(8, min(1024, (rt // 8) * 8))
    n_up8 = -(-N // 8) * 8
    row_tile = int(min(row_tile, n_up8))
    num_tiles = -(-N // row_tile)

    # Keep x in its native dtype (cast to f32 happens inside the kernel, in
    # VMEM).  No host-side padding: the last partial tile is masked in-kernel.
    xf = x.reshape(N, V)
    tgt2d = target.reshape(N, 1).astype(jnp.int32)

    in_tile = row_tile * V * jnp.dtype(x.dtype).itemsize
    f32_tile = row_tile * V * 4
    vmem_limit = int(min(48 * 1024 * 1024,
                         max(4 * 1024 * 1024, 2 * in_tile + 8 * f32_tile)))

    # TODO(synk): for very large vocab (>=64k) add a vocab-chunk grid axis with
    # an online-softmax running max/denominator instead of full-V row slabs.

    ls_kernel = functools.partial(
        _label_smoothing_kernel, padding_idx=padding_idx,
        confidence=confidence, smooth_val=smooth_val, c_const=c_const,
        n_rows=N)

    part = pl.pallas_call(
        ls_kernel,
        out_shape=jax.ShapeDtypeStruct((num_tiles * 8, 128), jnp.float32),
        grid_spec=pl.GridSpec(
            grid=(num_tiles,),
            in_specs=[pl.BlockSpec((row_tile, V), lambda i: (i, 0)),
                      pl.BlockSpec((row_tile, 1), lambda i: (i, 0))],
            out_specs=pl.BlockSpec((8, 128), lambda i: (i, 0))),
        compiler_params=pltpu.CompilerParams(
            dimension_semantics=("parallel",),
            vmem_limit_bytes=vmem_limit),
    )(xf, tgt2d)

    part = part.reshape(num_tiles, 8, 128)
    kl_sum = jnp.sum(part[:, 0, 0])
    nonpad = jnp.sum(part[:, 1, 0])

    # --- router losses: tiny arrays; put the token axis N on the lane axis ---
    K = topk_values.shape[-1]
    E = gate_logits.shape[-1]
    vals_t = topk_values.reshape(N, K).T                       # (K, N)
    idx_t = topk_indices.reshape(N, K).astype(jnp.int32).T     # (K, N)
    gate_t = gate_logits.reshape(N, E).T                       # (E, N)
    # TODO(synk): tile the router kernel over N with per-expert SMEM partials
    # if sequences grow long enough that (E + 2K) * N * 4 bytes stresses VMEM.

    r_kernel = functools.partial(_router_kernel, num_experts=num_experts,
                                 num_elements=N)
    load_loss, z_loss = pl.pallas_call(
        r_kernel,
        out_shape=(jax.ShapeDtypeStruct((1, 1), jnp.float32),
                   jax.ShapeDtypeStruct((1, 1), jnp.float32)),
        grid_spec=pl.GridSpec(
            grid=(1,),
            in_specs=[pl.BlockSpec((K, N), lambda i: (0, 0)),
                      pl.BlockSpec((K, N), lambda i: (0, 0)),
                      pl.BlockSpec((E, N), lambda i: (0, 0))],
            out_specs=(pl.BlockSpec((1, 1), lambda i: (0, 0),
                                    memory_space=pltpu.SMEM),
                       pl.BlockSpec((1, 1), lambda i: (0, 0),
                                    memory_space=pltpu.SMEM))),
    )(vals_t, idx_t, gate_t)

    denom = nonpad if normalize_length else jnp.float32(B)
    label_smoothing_loss = kl_sum / denom
    total = (label_smoothing_loss
             + jnp.float32(load_balance_loss_coef) * load_loss[0, 0]
             + jnp.float32(z_loss_coeff) * z_loss[0, 0])
    return total


# ---------------------------------------------------------------------------
# Pure-JAX reference (for sanity check only)
# ---------------------------------------------------------------------------
def _reference(x, target, topk_values, topk_indices, gate_logits, *, size,
               padding_idx, smoothing, normalize_length, num_experts,
               load_balance_loss_coef, z_loss_coeff):
    B, T, V = x.shape
    xf = x.reshape(-1, V).astype(jnp.float32)
    tgt = target.reshape(-1)
    ignore = tgt == padding_idx
    total_cnt = tgt.shape[0] - jnp.sum(ignore)
    tgt_safe = jnp.where(ignore, 0, tgt)
    td = jnp.full_like(xf, smoothing / (size - 1))
    td = td.at[jnp.arange(xf.shape[0]), tgt_safe].set(1.0 - smoothing)
    logp = jax.nn.log_softmax(xf, axis=-1)
    kl = jnp.where(td > 0, td * (jnp.log(jnp.maximum(td, 1e-30)) - logp), 0.0)
    kl = jnp.where(ignore[:, None], 0.0, kl)
    denom = total_cnt if normalize_length else B
    ls = jnp.sum(kl) / denom

    N = B * T
    vals = topk_values.reshape(N, -1).astype(jnp.float32)
    idx = topk_indices.reshape(N, -1)
    loads = jnp.array([jnp.sum(idx == e) for e in range(num_experts)],
                      dtype=jnp.float32)
    lsums = jnp.array([jnp.sum(vals * (idx == e)) for e in range(num_experts)],
                      dtype=jnp.float32)
    load_loss = num_experts / N * jnp.sum(loads * lsums)
    z = jax.scipy.special.logsumexp(
        gate_logits.reshape(N, -1).astype(jnp.float32), axis=-1)
    z_loss = jnp.mean(jnp.square(z))
    return ls + load_balance_loss_coef * load_loss + z_loss_coeff * z_loss


if __name__ == "__main__":
    B, T, V = 2, 8, 32          # batch, seqlen, num classes
    E, K = 8, 2                 # num_experts, top-k
    padding_idx = -1
    smoothing = 0.1
    load_coef = 0.01
    z_coef = 0.001

    key = jax.random.PRNGKey(0)
    k1, k2, k3 = jax.random.split(key, 3)

    x = jax.random.normal(k1, (B, T, V), dtype=jnp.float32)
    target = jax.random.randint(k2, (B, T), 0, V, dtype=jnp.int32)
    # mark a couple of positions as padding
    target = target.at[0, T - 1].set(padding_idx)
    target = target.at[1, T - 2].set(padding_idx)

    gate_logits = jax.random.normal(k3, (B, T, E), dtype=jnp.float32)
    gate_probs = jax.nn.softmax(gate_logits, axis=-1)
    topk_values, topk_indices = jax.lax.top_k(gate_probs, K)
    topk_indices = topk_indices.astype(jnp.int32)

    out = label_smoothing_loss_moe(
        x, target, topk_values, topk_indices, gate_logits,
        size=V, padding_idx=padding_idx, smoothing=smoothing,
        normalize_length=False, num_experts=E,
        load_balance_loss_coef=load_coef, z_loss_coeff=z_coef)
    out = jax.block_until_ready(out)

    ref = _reference(
        x, target, topk_values, topk_indices, gate_logits,
        size=V, padding_idx=padding_idx, smoothing=smoothing,
        normalize_length=False, num_experts=E,
        load_balance_loss_coef=load_coef, z_loss_coeff=z_coef)
    assert jnp.allclose(out, ref, rtol=2e-4, atol=1e-4), (out, ref)

    print("KERNEL_OK")
</pallas_src>

<mosaic_0001>
module attributes {stable_mosaic.version = 11 : i64} {
  func.func @_label_smoothing_kernel(%arg0: i32, %arg1: memref<16x32xf32, #tpu.memory_space<vmem>>, %arg2: memref<16x1xi32, #tpu.memory_space<vmem>>, %arg3: memref<8x128xf32, #tpu.memory_space<vmem>>) attributes {dimension_semantics = [#tpu.dimension_semantics<parallel>], iteration_bounds = array<i64: 1>, scalar_prefetch = 0 : i64, scratch_operands = 0 : i64, tpu.core_type = #tpu.core_type<tc>, window_params = [{transform_indices = @transform_0, window_bounds = array<i64: 16, 32>}, {transform_indices = @transform_1, window_bounds = array<i64: 16, 1>}, {transform_indices = @transform_2, window_bounds = array<i64: 8, 128>}]} {
    %c0 = arith.constant 0 : index
    %c0_0 = arith.constant 0 : index
    %0 = vector.load %arg1[%c0, %c0_0] : memref<16x32xf32, #tpu.memory_space<vmem>>, vector<16x32xf32>
    %c0_1 = arith.constant 0 : index
    %c0_2 = arith.constant 0 : index
    %1 = vector.load %arg2[%c0_1, %c0_2] : memref<16x1xi32, #tpu.memory_space<vmem>>, vector<16x1xi32>
    %c16_i32 = arith.constant 16 : i32
    %2 = arith.muli %arg0, %c16_i32 : i32
    %3 = tpu.iota {dimensions = array<i32: 0>} : vector<16x1xi32>
    %4 = vector.broadcast %2 : i32 to vector<16x1xi32>
    %5 = arith.addi %4, %3 : vector<16x1xi32>
    %c16_i32_3 = arith.constant 16 : i32
    %6 = vector.broadcast %c16_i32_3 : i32 to vector<16x1xi32>
    %7 = arith.cmpi slt, %5, %6 : vector<16x1xi32>
    %c-1_i32 = arith.constant -1 : i32
    %8 = vector.broadcast %c-1_i32 : i32 to vector<16x1xi32>
    %9 = arith.cmpi eq, %1, %8 : vector<16x1xi32>
    %cst = arith.constant dense<true> : vector<16x1xi1>
    %10 = arith.xori %9, %cst : vector<16x1xi1>
    %11 = arith.andi %7, %10 : vector<16x1xi1>
    %c0_i32 = arith.constant 0 : i32
    %12 = vector.broadcast %c0_i32 : i32 to vector<16x1xi32>
    %13 = arith.select %9, %12, %1 : vector<16x1xi1>, vector<16x1xi32>
    %cst_4 = arith.constant dense<0xFF800000> : vector<16xf32>
    %14 = vector.multi_reduction <maximumf>, %0, %cst_4 [1] : vector<16x32xf32> to vector<16xf32>
    %15 = vector.shape_cast %14 : vector<16xf32> to vector<16x1xf32>
    %16 = vector.broadcast %15 : vector<16x1xf32> to vector<16x32xf32>
    %17 = arith.subf %0, %16 : vector<16x32xf32>
    %18 = math.exp %17 : vector<16x32xf32>
    %cst_5 = arith.constant dense<0.000000e+00> : vector<16xf32>
    %19 = vector.multi_reduction <add>, %18, %cst_5 [1] : vector<16x32xf32> to vector<16xf32>
    %20 = vector.shape_cast %19 : vector<16xf32> to vector<16x1xf32>
    %21 = math.log %20 : vector<16x1xf32>
    %22 = arith.addf %15, %21 : vector<16x1xf32>
    %cst_6 = arith.constant dense<0.000000e+00> : vector<16xf32>
    %23 = vector.multi_reduction <add>, %0, %cst_6 [1] : vector<16x32xf32> to vector<16xf32>
    %24 = vector.shape_cast %23 : vector<16xf32> to vector<16x1xf32>
    %25 = tpu.iota {dimensions = array<i32: 1>} : vector<16x32xi32>
    %26 = vector.broadcast %13 : vector<16x1xi32> to vector<16x32xi32>
    %27 = arith.cmpi eq, %25, %26 : vector<16x32xi32>
    %cst_7 = arith.constant 0.000000e+00 : f32
    %28 = vector.broadcast %cst_7 : f32 to vector<16x32xf32>
    %29 = arith.select %27, %0, %28 : vector<16x32xi1>, vector<16x32xf32>
    %cst_8 = arith.constant dense<0.000000e+00> : vector<16xf32>
    %30 = vector.multi_reduction <add>, %29, %cst_8 [1] : vector<16x32xf32> to vector<16xf32>
    %31 = vector.shape_cast %30 : vector<16xf32> to vector<16x1xf32>
    %32 = arith.subf %31, %22 : vector<16x1xf32>
    %cst_9 = arith.constant 3.200000e+01 : f32
    %33 = vector.broadcast %cst_9 : f32 to vector<16x1xf32>
    %34 = arith.mulf %33, %22 : vector<16x1xf32>
    %35 = arith.subf %24, %34 : vector<16x1xf32>
    %cst_10 = arith.constant 0.896774172 : f32
    %36 = vector.broadcast %cst_10 : f32 to vector<16x1xf32>
    %37 = arith.mulf %36, %32 : vector<16x1xf32>
    %cst_11 = arith.constant -0.668481708 : f32
    %38 = vector.broadcast %cst_11 : f32 to vector<16x1xf32>
    %39 = arith.subf %38, %37 : vector<16x1xf32>
    %cst_12 = arith.constant 0.0032258064 : f32
    %40 = vector.broadcast %cst_12 : f32 to vector<16x1xf32>
    %41 = arith.mulf %40, %35 : vector<16x1xf32>
    %42 = arith.subf %39, %41 : vector<16x1xf32>
    %cst_13 = arith.constant 0.000000e+00 : f32
    %43 = vector.broadcast %cst_13 : f32 to vector<16x1xf32>
    %44 = arith.select %11, %42, %43 : vector<16x1xi1>, vector<16x1xf32>
    %45 = arith.extui %11 : vector<16x1xi1> to vector<16x1xi32>
    %46 = arith.sitofp %45 : vector<16x1xi32> to vector<16x1xf32>
    %47 = vector.shape_cast %44 : vector<16x1xf32> to vector<1x16x1xf32>
    %cst_14 = arith.constant dense<0.000000e+00> : vector<1xf32>
    %48 = vector.multi_reduction <add>, %47, %cst_14 [1, 2] : vector<1x16x1xf32> to vector<1xf32>
    %49 = vector.shape_cast %48 : vector<1xf32> to vector<1x1x1xf32>
    %50 = vector.extract %49[0, 0, 0] : f32 from vector<1x1x1xf32>
    %51 = vector.shape_cast %46 : vector<16x1xf32> to vector<1x16x1xf32>
    %cst_15 = arith.constant dense<0.000000e+00> : vector<1xf32>
    %52 = vector.multi_reduction <add>, %51, %cst_15 [1, 2] : vector<1x16x1xf32> to vector<1xf32>
    %53 = vector.shape_cast %52 : vector<1xf32> to vector<1x1x1xf32>
    %54 = vector.extract %53[0, 0, 0] : f32 from vector<1x1x1xf32>
    %55 = tpu.iota {dimensions = array<i32: 0>} : vector<8x128xi32>
    %c0_i32_16 = arith.constant 0 : i32
    %56 = vector.broadcast %c0_i32_16 : i32 to vector<8x128xi32>
    %57 = arith.cmpi eq, %55, %56 : vector<8x128xi32>
    %c1_i32 = arith.constant 1 : i32
    %58 = vector.broadcast %c1_i32 : i32 to vector<8x128xi32>
    %59 = arith.cmpi eq, %55, %58 : vector<8x128xi32>
    %cst_17 = arith.constant 0.000000e+00 : f32
    %60 = vector.broadcast %54 : f32 to vector<8x128xf32>
    %61 = vector.broadcast %cst_17 : f32 to vector<8x128xf32>
    %62 = arith.select %59, %60, %61 : vector<8x128xi1>, vector<8x128xf32>
    %63 = vector.broadcast %50 : f32 to vector<8x128xf32>
    %64 = arith.select %57, %63, %62 : vector<8x128xi1>, vector<8x128xf32>
    %c0_18 = arith.constant 0 : index
    %c0_19 = arith.constant 0 : index
    %65 = vector.load %arg3[%c0_18, %c0_19] : memref<8x128xf32, #tpu.memory_space<vmem>>, vector<8x128xf32>
    tpu.vector_store %arg3[%c0_18, %c0_19], %64 {strides = array<i32>} : memref<8x128xf32, #tpu.memory_space<vmem>>, vector<8x128xf32>,
    return
  }
  func.func @transform_0(%arg0: i32) -> (i32, i32) {
    %c0_i32 = arith.constant 0 : i32
    %c0_i32_0 = arith.constant 0 : i32
    return %arg0, %c0_i32 : i32, i32
  }
  func.func @transform_1(%arg0: i32) -> (i32, i32) {
    %c0_i32 = arith.constant 0 : i32
    %c0_i32_0 = arith.constant 0 : i32
    return %arg0, %c0_i32 : i32, i32
  }
  func.func @transform_2(%arg0: i32) -> (i32, i32) {
    %c0_i32 = arith.constant 0 : i32
    %c0_i32_0 = arith.constant 0 : i32
    return %arg0, %c0_i32 : i32, i32
  }
}

</mosaic_0001>

<bundles_post_ra>
// kernel: tpu_custom_call.1
= control target key start
LH: loop header
LB: loop body
LE: loop exit
PB: predicated region body
PF: predicated region fallthrough
CT: control target
= control target key end

     0   :  { %vm33_vm0 = vcmask 261120   ;;  %v190_v4 = vmov 0   ;;  %s258_s0 = inlined_call_operand.vmem [shape: f32[16,32], index: 0, kind: input, shape index: {}]   ;;  %s259_s1 = inlined_call_operand.vmem [shape: s32[16,1], index: 1, kind: input, shape index: {}]   ;;  %s260_s2 = inlined_call_operand.hbm [shape: f32[8,128], index: 2, kind: output, shape index: {}]  }
   0x1   :  { %v12_v0 = vld [vmem:[%s258_s0] sm:$0xff]  ;;  %v13_v1 = vld [vmem:[%s258_s0 + $0x8] sm:$0xff]  ;;  %158 = vset.pattern.permute.xlu1 %v190_v4  ;;  %159 = vset.pattern.permute.xlu0 %v190_v4 }
   0x2   :  { %v14_v2 = vld [vmem:[%s259_s1] sm:$0xff]  ;;  %v34_v3 = vsel %vm33_vm0, %v12_v0, -inf  ;;  %v15_v5 = vld [vmem:[%s259_s1 + $0x8] sm:$0xff] }
   0x3   :  { %vm25_vm1 = vcmp.eq.s32.totalorder %v14_v2, 4294967295 }
   0x4   :  { %7 = vsyncpa [#allocation3], 0  ;;  %35 = vmax.xlane.f32.xlu0 %v34_v3  ;;  %v31_v6 = vsel %vm25_vm1, 0, %v14_v2  ;;  %vm26_vm2 = vcmp.eq.s32.totalorder %v15_v5, 4294967295  ;;  %v37_v7 = vsel %vm33_vm0, %v13_v1, -inf  ;;  %v17_v15 = vlaneseq  ;;  %s193_s1 = smov [#allocation2]  }
   0x5   :  { %67 = vperm.xlu1 %158, %v31_v6   ;;  %v32_v8 = vsel %vm26_vm2, 0, %v15_v5  ;;  %v58_v27 = vsel %vm33_vm0, %v12_v0, 0.0  ;;  %v61_v28 = vsel %vm33_vm0, %v13_v1, 0.0  ;;  %vm191_vm5 = vmmov 1   ;;  %s140_s17 = sshll.u32 %s193_s1, 4  ;;  %s141_s17 = int_to_ptr.vmem [resolvable:$true] %s140_s17 }
   0x6   :  { %v65_v17 = vand.u32 127, %v17_v15  ;;  %vm233_vm6 = vmxor %vm25_vm1, %vm191_vm5  ;;  %vm102_vm8 = vcmask 7168   ;;  %v192_v31 = vmov 0.0   ;;  %s168_s19 = scalar_lea.vmem %s141_s17, 128  ;;  %p173_p1 = scmp.lt.s32.totalorder %s141_s17, %s141_s17 }
   0x7   :  { %vm238_vm7 = vmxor %vm26_vm2, %vm191_vm5  ;;  %v148_v32 = vsel %vm233_vm6, 1.0, %v192_v31  ;;  %p169_p0 = scmp.ne.s32.totalorder %s141_s17, %s168_s19  ;;  %p174_p2 = scmp.lt.s32.totalorder %s168_s19, %s168_s19 }
   0x8   :  { %38 = vmax.xlane.f32.xlu0 %v37_v7  ;;  %v149_v33 = vsel %vm238_vm7, 1.0, %v192_v31  ;;  %v115_v34 = vsel %vm102_vm8, %v148_v32, 0.0 }
   0x9   :  { %70 = vperm.xlu1 %158, %v32_v8   ;;  %v116_v35 = vsel %vm102_vm8, %v149_v33, 0.0  ;;  %p175_p3 = por %p174_p2, %p173_p1 }
   0xa   :  { %v117_v36 = vadd.f32 %v116_v35, %v115_v34 }
   0xb   :  { %p176_p4 = pnand %p175_p3, %p169_p0 }
  0x80   :  { %v68_v16 = vpop.permute.xlu1 %67 }
  0x81   :  { %vm72_vm3 = vcmp.eq.s32.totalorder %v65_v17, %v68_v16 }
  0x82   :  { %v74_v20 = vsel %vm72_vm3, %v12_v0, 0.0 }
  0x83   :  { %v76_v22 = vsel %vm33_vm0, %v74_v20, 0.0 }
  0x84   :  { %v71_v18 = vpop.permute.xlu1 %70 }
  0x85   :  { %vm73_vm4 = vcmp.eq.s32.totalorder %v65_v17, %v71_v18 }
  0x86   :  { %v75_v24 = vsel %vm73_vm4, %v13_v1, 0.0 }
  0x87   :  { %v79_v26 = vsel %vm33_vm0, %v75_v24, 0.0 }
  0x8d   :  { %v36_v9 = vpop.xlane.xlu0 %35 }
  0x8e   :  { %v40_v10 = vsub.f32 %v12_v0, %v36_v9 }
  0x90   :  { %v42_v11 = vmul.f32 1.442695, %v40_v10 }
  0x91   :  { %v39_v12 = vpop.xlane.xlu0 %38 }
  0x92   :  { %160 = vpow2.f32 %v42_v11  ;;  %v41_v13 = vsub.f32 %v13_v1, %v39_v12 }
  0x94   :  { %v44_v14 = vmul.f32 1.442695, %v41_v13 }
  0x96   :  { %162 = vpow2.f32 %v44_v14 }
  0x9f   :  { %v161_v19 = vpop.eup %160 }
  0xa0   :  { %v46_v21 = vsel %vm33_vm0, %v161_v19, 0.0  ;;  %v18_v19 = vshrl.u32 %v17_v15, 7 }
  0xa1   :  { %47 = vadd.xlane.f32.xlu0 %v46_v21 }
  0xa2   :  { %vm128_vm9 = vcmp.eq.s32.totalorder %v18_v19, 1  ;;  %vm127_vm10 = vcmp.eq.s32.totalorder %v18_v19, 0 }
  0xa3   :  { %v163_v23 = vpop.eup %162 }
  0xa4   :  { %v49_v25 = vsel %vm33_vm0, %v163_v23, 0.0 }
  0xa5   :  { %50 = vadd.xlane.f32.xlu1 %v49_v25  ;;  %77 = vadd.xlane.f32.xlu0 %v76_v22 }
  0xa9   :  { %80 = vadd.xlane.f32.xlu0 %v79_v26 }
  0xad   :  { %59 = vadd.xlane.f32.xlu0 %v58_v27 }
  0xb1   :  { %62 = vadd.xlane.f32.xlu0 %v61_v28 }
 0x12a   :  { %v48_v37 = vpop.xlane.xlu0 %47 }
 0x12b   :  { %164 = vlog2.f32 %v48_v37 }
 0x12e   :  { %v51_v38 = vpop.xlane.xlu1 %50  ;;  %v78_v39 = vpop.xlane.xlu0 %77 }
 0x12f   :  { %166 = vlog2.f32 %v51_v38 }
 0x132   :  { %v81_v40 = vpop.xlane.xlu0 %80 }
 0x136   :  { %v60_v43 = vpop.xlane.xlu0 %59 }
 0x138   :  { %v165_v41 = vpop.eup %164 }
 0x139   :  { %v53_v42 = vmul.f32 0.6931472, %v165_v41 }
 0x13a   :  { %v63_v52 = vpop.xlane.xlu0 %62 }
 0x13b   :  { %v56_v44 = vadd.f32 %v53_v42, %v36_v9 }
 0x13c   :  { %v167_v45 = vpop.eup %166 }
 0x13d   :  { %v55_v46 = vmul.f32 0.6931472, %v167_v45  ;;  %v82_v47 = vsub.f32 %v78_v39, %v56_v44  ;;  %v84_v48 = vmul.f32 32.0, %v56_v44 }
 0x13f   :  { %v88_v49 = vmul.f32 0.8967742, %v82_v47  ;;  %v57_v50 = vadd.f32 %v55_v46, %v39_v12  ;;  %v86_v51 = vsub.f32 %v60_v43, %v84_v48 }
 0x141   :  { %v90_v53 = vsub.f32 -0.6684817, %v88_v49  ;;  %v83_v54 = vsub.f32 %v81_v40, %v57_v50  ;;  %v92_v55 = vmul.f32 0.0032258064, %v86_v51  ;;  %v85_v56 = vmul.f32 32.0, %v57_v50 }
 0x143   :  { %v89_v57 = vmul.f32 0.8967742, %v83_v54  ;;  %v94_v58 = vsub.f32 %v90_v53, %v92_v55  ;;  %v87_v59 = vsub.f32 %v63_v52, %v85_v56 }
 0x145   :  { %v91_v60 = vsub.f32 -0.6684817, %v89_v57  ;;  %v93_v61 = vmul.f32 0.0032258064, %v87_v59  ;;  %v96_v63 = vsel %vm233_vm6, %v94_v58, 0.0 }
 0x146   :  { %v103_v1 = vsel %vm102_vm8, %v96_v63, 0.0 }
 0x147   :  { %v95_v62 = vsub.f32 %v91_v60, %v93_v61 }
 0x149   :  { %v97_v0 = vsel %vm238_vm7, %v95_v62, 0.0 }
 0x14a   :  { %v104_v2 = vsel %vm102_vm8, %v97_v0, 0.0 }
 0x14b   :  { %v105_v3 = vadd.f32 %v104_v2, %v103_v1 }
 0x14d   :  { %106 = vadd.xlane.f32.xlu0 %v105_v3 }
 0x151   :  { %118 = vadd.xlane.f32.xlu0 %v117_v36 }
 0x1d6   :  { %v107_v4 = vpop.xlane.xlu0 %106 }
 0x1d7   :  { %v108_v5 = vrot.slane %v107_v4, 4 }
 0x1d9   :  { %v109_v6 = vadd.f32 %v108_v5, %v107_v4 }
 0x1da   :  { %v119_v7 = vpop.xlane.xlu0 %118 }
 0x1db   :  { %v110_v8 = vrot.slane %v109_v6, 2  ;;  %v120_v9 = vrot.slane %v119_v7, 4 }
 0x1dd   :  { %v121_v10 = vadd.f32 %v120_v9, %v119_v7  ;;  %v111_v11 = vadd.f32 %v110_v8, %v109_v6 }
 0x1df   :  { %v122_v12 = vrot.slane %v121_v10, 2  ;;  %v112_v13 = vrot.slane %v111_v11, 1 }
 0x1e1   :  { %v123_v14 = vadd.f32 %v122_v12, %v121_v10  ;;  %v113_v16 = vadd.f32 %v112_v13, %v111_v11 }
 0x1e3   :  { %150 = vpush %v113_v16  ;;  %v124_v17 = vrot.slane %v123_v14, 1 }
 0x1e5   :  { %v125_v18 = vadd.f32 %v124_v17, %v123_v14 }
 0x1e7   :  { %152 = vpush %v125_v18 }
 0x214   :  { %s151_s0 = spop %150 }
 0x215   :  { %v131_v21 = vstv %s151_s0 }
 0x218   :  { %s153_s18 = spop %152 }
 0x219   :  { %v129_v20 = vstv %s153_s18 }
 0x21a   :  { %v130_v22 = vsel %vm128_vm9, %v129_v20, 0.0 }
 0x21b   :  { %v132_v23 = vsel %vm127_vm10, %v131_v21, %v130_v22 }
 0x21c   :  { %133 = vst [vmem:[#allocation2] sm:$0xff] %v132_v23 }
 0x21d   :  { %179 = shalt.err (!%p176_p4)
}
 0x21e   :  { %143 = dma.vmem_to_hbm [thread:$0]  %s141_s17, 128, %s260_s2, [#allocation3]  }
 0x21f   :  { %188 = dma.done.wait [#allocation3], 128  }
 0x220   :  { %189 = vsyncadd [#allocation3], 4294967168 }
 0x221   :  { %147 = vsyncpa [#allocation3], 1 }

</bundles_post_ra>
